<compile_context>
chip_gen: v7x
topology: tpu7x:2x2x1
jax: 0.10.0
libtpu: 0.0.40
codegen_flags: <defaults>
</compile_context>

<pallas_src>
import functools

import jax
import jax.numpy as jnp
from jax.experimental import pallas as pl
from jax.experimental.pallas import tpu as pltpu

_LANE = 128
_SUBLANE = 8
_VMEM_LIMIT_BYTES = 32 * 1024 * 1024     # scoped VMEM limit (safe on v5e/v6e/v7x)
_TILE_BUDGET_BYTES = 12 * 1024 * 1024    # (input + output) bytes per tile;
                                         # double-buffered -> <= ~24 MiB resident
_MAX_TILE_I = 1024


def _round_up(n, m):
    return ((n + m - 1) // m) * m


def _norm_kernel(x_ref, out_ref, *, num_components, f_pad):
    # x_ref: (TILE_I, M * F_pad) in VMEM; out_ref: (TILE_I, F_pad).
    # Unrolled sum-of-squares over M lane-aligned F_pad-wide chunks (pure VPU,
    # no cross-sublane XLU reduce, no sublane padding).
    acc = None
    for m in range(num_components):
        xm = x_ref[:, m * f_pad:(m + 1) * f_pad].astype(jnp.float32)
        sq = xm * xm
        acc = sq if acc is None else acc + sq
    out_ref[...] = (acc + 1e-07).astype(out_ref.dtype)


def norm_layer_forward(x):
    """Pallas implementation of NormLayer.forward (nonlinearity=None)."""
    I, M, F = x.shape

    # Lane-dense feature axis: pad F up to a multiple of 128 (zeros don't change
    # the sum of squares; padded columns are sliced off at the end).
    f_pad = max(_LANE, _round_up(F, _LANE))
    if f_pad != F:
        x = jnp.pad(x, ((0, 0), (0, 0), (0, f_pad - F)))

    # Pick the largest sample tile whose double-buffered footprint fits the budget.
    itemsize = jnp.dtype(x.dtype).itemsize
    bytes_per_row = (M * f_pad) * itemsize + f_pad * 4     # input row + f32 output row
    max_rows = max(_SUBLANE,
                   (_TILE_BUDGET_BYTES // bytes_per_row) // _SUBLANE * _SUBLANE)
    tile_i = min(_MAX_TILE_I, max_rows, _round_up(I, _SUBLANE))
    tile_i = max(_SUBLANE, (tile_i // _SUBLANE) * _SUBLANE)

    # Pad the sample axis to a tile multiple (no divisibility requirement on callers).
    i_pad = _round_up(I, tile_i)
    if i_pad != I:
        x = jnp.pad(x, ((0, i_pad - I), (0, 0), (0, 0)))

    # Row-major metadata-only reshape: sublanes = samples, lanes = M*F_pad.
    x2 = x.reshape(i_pad, M * f_pad)

    kernel = functools.partial(_norm_kernel, num_components=M, f_pad=f_pad)
    norm_padded = pl.pallas_call(
        kernel,
        out_shape=jax.ShapeDtypeStruct((i_pad, f_pad), jnp.float32),
        grid_spec=pltpu.PrefetchScalarGridSpec(
            num_scalar_prefetch=0,
            grid=(i_pad // tile_i,),
            in_specs=[pl.BlockSpec((tile_i, M * f_pad), lambda i: (i, 0))],
            out_specs=pl.BlockSpec((tile_i, f_pad), lambda i: (i, 0)),
        ),
        compiler_params=pltpu.CompilerParams(
            dimension_semantics=("parallel",),   # lets v7x shard the I axis over both TCs
            vmem_limit_bytes=_VMEM_LIMIT_BYTES,
        ),
        cost_estimate=pl.CostEstimate(
            flops=2 * i_pad * M * f_pad,
            transcendentals=0,
            bytes_accessed=i_pad * M * f_pad * itemsize + i_pad * f_pad * 4,
        ),
    )(x2)

    # TODO(synk): the torch forward also builds a fresh nn.LayerNorm and calls
    # rescale(); both results (new_norm, norm_x) are discarded before `return norm`,
    # so they are intentionally not emitted here.
    return norm_padded[:I, :F]


def _reference(x):
    # pure-JAX reference of norm_over_components(x)
    return jnp.sum(x.astype(jnp.float32) ** 2, axis=1) + 1e-07


if __name__ == "__main__":
    key = jax.random.PRNGKey(0)
    I, M, F = 16, 4, 32  # samples, components, features
    x = jax.random.normal(key, (I, M, F), dtype=jnp.float32)

    out = jax.block_until_ready(norm_layer_forward(x))

    ref = _reference(x)
    assert out.shape == (I, F), out.shape
    assert jnp.allclose(out, ref, rtol=1e-5, atol=1e-5), "mismatch vs reference"

    print("KERNEL_OK")
</pallas_src>

<mosaic_0001>
module attributes {stable_mosaic.version = 11 : i64} {
  func.func @_norm_kernel(%arg0: i32, %arg1: memref<16x512xf32, #tpu.memory_space<vmem>>, %arg2: memref<16x128xf32, #tpu.memory_space<vmem>>) attributes {dimension_semantics = [#tpu.dimension_semantics<parallel>], iteration_bounds = array<i64: 1>, scalar_prefetch = 0 : i64, scratch_operands = 0 : i64, tpu.core_type = #tpu.core_type<tc>, window_params = [{transform_indices = @transform_0, window_bounds = array<i64: 16, 512>}, {transform_indices = @transform_1, window_bounds = array<i64: 16, 128>}]} {
    %c0 = arith.constant 0 : index
    %c0_0 = arith.constant 0 : index
    %0 = vector.load %arg1[%c0, %c0_0] : memref<16x512xf32, #tpu.memory_space<vmem>>, vector<16x128xf32>
    %1 = arith.mulf %0, %0 : vector<16x128xf32>
    %c0_1 = arith.constant 0 : index
    %c128 = arith.constant 128 : index
    %2 = vector.load %arg1[%c0_1, %c128] : memref<16x512xf32, #tpu.memory_space<vmem>>, vector<16x128xf32>
    %3 = arith.mulf %2, %2 : vector<16x128xf32>
    %4 = arith.addf %1, %3 : vector<16x128xf32>
    %c0_2 = arith.constant 0 : index
    %c256 = arith.constant 256 : index
    %5 = vector.load %arg1[%c0_2, %c256] : memref<16x512xf32, #tpu.memory_space<vmem>>, vector<16x128xf32>
    %6 = arith.mulf %5, %5 : vector<16x128xf32>
    %7 = arith.addf %4, %6 : vector<16x128xf32>
    %c0_3 = arith.constant 0 : index
    %c384 = arith.constant 384 : index
    %8 = vector.load %arg1[%c0_3, %c384] : memref<16x512xf32, #tpu.memory_space<vmem>>, vector<16x128xf32>
    %9 = arith.mulf %8, %8 : vector<16x128xf32>
    %10 = arith.addf %7, %9 : vector<16x128xf32>
    %cst = arith.constant 1.000000e-07 : f32
    %11 = vector.broadcast %cst : f32 to vector<16x128xf32>
    %12 = arith.addf %10, %11 : vector<16x128xf32>
    %c0_4 = arith.constant 0 : index
    %c0_5 = arith.constant 0 : index
    %13 = vector.load %arg2[%c0_4, %c0_5] : memref<16x128xf32, #tpu.memory_space<vmem>>, vector<16x128xf32>
    tpu.vector_store %arg2[%c0_4, %c0_5], %12 {strides = array<i32>} : memref<16x128xf32, #tpu.memory_space<vmem>>, vector<16x128xf32>,
    return
  }
  func.func @transform_0(%arg0: i32) -> (i32, i32) {
    %c0_i32 = arith.constant 0 : i32
    %c0_i32_0 = arith.constant 0 : i32
    return %arg0, %c0_i32 : i32, i32
  }
  func.func @transform_1(%arg0: i32) -> (i32, i32) {
    %c0_i32 = arith.constant 0 : i32
    %c0_i32_0 = arith.constant 0 : i32
    return %arg0, %c0_i32 : i32, i32
  }
}

</mosaic_0001>

<bundles_post_ra>
// kernel: tpu_custom_call.1
= control target key start
LH: loop header
LB: loop body
LE: loop exit
PB: predicated region body
PF: predicated region fallthrough
CT: control target
= control target key end

     0   :  { %6 = vsyncpa [#allocation3], 0  ;;  %s160_s0 = inlined_call_operand.hbm [shape: f32[16,512], index: 0, kind: input, shape index: {}]   ;;  %s161_s1 = inlined_call_operand.hbm [shape: f32[16,128], index: 1, kind: output, shape index: {}]  }
   0x1   :  { %7 = vsyncpa [#allocation4], 0  ;;  %s120_s6 = smov [#allocation2]   ;;  %s72_s10 = scalar_lea.hbm %s160_s0, 1024 }
   0x2   :  { %s13_s7 = sshll.u32 %s120_s6, 4  ;;  %p73_p0 = scmp.ne.s32.totalorder %s160_s0, %s72_s10  ;;  %s14_s7 = int_to_ptr.vmem [resolvable:$true] %s13_s7 }
   0x3   :  { %p76_p1 = scmp.lt.u32.totalorder %s72_s10, %s160_s0 }
   0x5   :  { %p78_p2 = pnand %p76_p1, %p73_p0 }
   0x7   :  { %81 = shalt.err (!%p78_p2)
}
   0x8   :  { %s82_s15 = scalar_lea.vmem %s14_s7, 1024  ;;  %p87_p4 = scmp.lt.s32.totalorder %s14_s7, %s14_s7 }
   0x9   :  { %p83_p3 = scmp.ne.s32.totalorder %s14_s7, %s82_s15  ;;  %p88_p5 = scmp.lt.s32.totalorder %s82_s15, %s82_s15 }
   0xb   :  { %p89_p6 = por %p88_p5, %p87_p4 }
   0xd   :  { %p90_p7 = pnand %p89_p6, %p83_p3 }
   0xf   :  { %93 = shalt.err (!%p90_p7)
}
  0x10   :  { %s121_s16 = smov 512   ;;  %s122_s17 = smov 32  }
  0x11   :  { %19 = dma.hbm_to_vmem [thread:$0]  %s160_s0, 1024, %s14_s7, [#allocation3], %s121_s16, %s121_s16, %s122_s17  }
  0x12   :  { %116 = dma.done.wait [#allocation3], 1024  }
  0x13   :  { %117 = vsyncadd [#allocation3], 4294966272  ;;  %v23_v0 = vld [vmem:[#allocation2] sm:$0xff]  ;;  %v27_v1 = vld [vmem:[#allocation2 + $0x8] sm:$0xff]  ;;  %s123_s0 = smov [#allocation5]  }
  0x14   :  { %v33_v2 = vld [vmem:[#allocation2 + $0x10] sm:$0xff]  ;;  %v25_v3 = vmul.f32 %v23_v0, %v23_v0  ;;  %v29_v4 = vmul.f32 %v27_v1, %v27_v1  ;;  %v39_v6 = vld [vmem:[#allocation2 + $0x18] sm:$0xff]  ;;  %v24_v7 = vld [vmem:[#allocation2 + $0x20] sm:$0xff]  ;;  %s54_s20 = sshll.u32 %s123_s0, 4  ;;  %s55_s20 = int_to_ptr.vmem [resolvable:$true] %s54_s20 }
  0x15   :  { %v35_v5 = vmul.f32 %v33_v2, %v33_v2  ;;  %v28_v8 = vld [vmem:[#allocation2 + $0x28] sm:$0xff]  ;;  %v26_v9 = vmul.f32 %v24_v7, %v24_v7  ;;  %v34_v11 = vld [vmem:[#allocation2 + $0x30] sm:$0xff]  ;;  %v40_v12 = vld [vmem:[#allocation2 + $0x38] sm:$0xff]  ;;  %v41_v14 = vmul.f32 %v39_v6, %v39_v6  ;;  %s94_s21 = scalar_lea.vmem %s55_s20, 256  ;;  %p99_p9 = scmp.lt.s32.totalorder %s55_s20, %s55_s20 }
  0x16   :  { %v30_v10 = vmul.f32 %v28_v8, %v28_v8  ;;  %v31_v13 = vadd.f32 %v29_v4, %v25_v3  ;;  %v36_v15 = vmul.f32 %v34_v11, %v34_v11  ;;  %v42_v17 = vmul.f32 %v40_v12, %v40_v12  ;;  %p95_p8 = scmp.ne.s32.totalorder %s55_s20, %s94_s21  ;;  %p100_p10 = scmp.lt.s32.totalorder %s94_s21, %s94_s21 }
  0x18   :  { %v32_v16 = vadd.f32 %v30_v10, %v26_v9  ;;  %v37_v18 = vadd.f32 %v35_v5, %v31_v13  ;;  %p101_p11 = por %p100_p10, %p99_p9 }
  0x1a   :  { %v38_v19 = vadd.f32 %v36_v15, %v32_v16  ;;  %v43_v20 = vadd.f32 %v41_v14, %v37_v18  ;;  %p102_p12 = pnand %p101_p11, %p95_p8 }
  0x1c   :  { %v44_v21 = vadd.f32 %v42_v17, %v38_v19  ;;  %v45_v22 = vadd.f32 1e-07, %v43_v20 }
  0x1e   :  { %v46_v23 = vadd.f32 1e-07, %v44_v21  ;;  %47 = vst [vmem:[#allocation5] sm:$0xff] %v45_v22 }
  0x20   :  { %48 = vst [vmem:[#allocation5 + $0x8] sm:$0xff] %v46_v23 }
  0x21   :  { %105 = shalt.err (!%p102_p12)
}
  0x22   :  { %s106_s24 = scalar_lea.hbm %s161_s1, 256 }
  0x23   :  { %p107_p13 = scmp.ne.s32.totalorder %s161_s1, %s106_s24  ;;  %p110_p0 = scmp.lt.u32.totalorder %s106_s24, %s161_s1 }
  0x25   :  { %p112_p1 = pnand %p110_p0, %p107_p13 }
  0x27   :  { %115 = shalt.err (!%p112_p1)
}
  0x28   :  { %s124_s29 = smov 128   ;;  %s125_s30 = smov 8  }
  0x29   :  { %60 = dma.vmem_to_hbm [thread:$0]  %s55_s20, 256, %s161_s1, [#allocation4], %s124_s29, %s124_s29, %s125_s30  }
  0x2a   :  { %118 = dma.done.wait [#allocation4], 256  }
  0x2b   :  { %119 = vsyncadd [#allocation4], 4294967040 }
  0x2c   :  { %64 = vsyncpa [#allocation3], 1 }
  0x2d   :  { %65 = vsyncpa [#allocation4], 1 }

</bundles_post_ra>
